<compile_context>
chip_gen: v7x
topology: tpu7x:2x2x1
jax: 0.10.0
libtpu: 0.0.40
codegen_flags: <defaults>
</compile_context>

<pallas_src>
import functools

import jax
import jax.numpy as jnp
from jax.experimental import pallas as pl
from jax.experimental.pallas import tpu as pltpu

NEG_SLOPE = 0.2
EPS = 1e-5  # PyTorch InstanceNorm2d default eps


def _conv_block_kernel(x_ref, mask_ref, w1_ref, w2_ref, o_ref, *, H, W):
    """Fused 2x (conv3x3 + InstanceNorm + LeakyReLU) for one image.

    x_ref:    (Cin,  H*W)    channel-major image (spatial on the lane axis)
    mask_ref: (9,    H*W)    1.0 where tap k reads an in-bounds pixel, else 0.0
    w1_ref:   (Cout, 9*Cin)  layer-1 weights, one contiguous tap-major slab
    w2_ref:   (Cout, 9*Cout) layer-2 weights
    o_ref:    (Cout, H*W)    output (lane-dense, already NCHW-flat)
    """
    HW = H * W
    inv_hw = 1.0 / HW

    def taps(xc):
        """(C, H*W) -> (9*C, H*W) im2col patch matrix, built in registers.

        Tap (dy, dx) of a 3x3 'same' conv reads pixel (h+dy-1, w+dx-1), i.e.
        flat position p + s with s = (dy-1)*W + (dx-1): a lane roll of the
        resident tile; out-of-image reads are zeroed by the mask (this is the
        conv's zero padding).
        """
        pieces = []
        for dy in range(3):
            for dx in range(3):
                s = (dy - 1) * W + (dx - 1)
                if s == 0:
                    pieces.append(xc)                      # centre tap, no shift
                    continue
                k = dy * 3 + dx
                shifted = jnp.roll(xc, -s, axis=1)         # shifted[c, p] = xc[c, p+s]
                pieces.append(shifted * mask_ref[k:k + 1, :])
        return jnp.concatenate(pieces, axis=0)             # (9*C, H*W)

    def instnorm_lrelu(acc):
        """InstanceNorm2d (no affine, biased var) + LeakyReLU(0.2) on (C, H*W)."""
        s1 = jnp.sum(acc, axis=1, keepdims=True)
        s2 = jnp.sum(acc * acc, axis=1, keepdims=True)
        mean = s1 * inv_hw
        var = jnp.maximum(s2 * inv_hw - mean * mean, 0.0)  # one-pass stats, clamped
        y = (acc - mean) * jax.lax.rsqrt(var + EPS)
        return jnp.where(y > 0, y, NEG_SLOPE * y)

    x = x_ref[...].astype(jnp.float32)

    # Layer 1: a single MXU matmul over all 9 taps, f32 accumulation.
    h1 = instnorm_lrelu(
        jnp.dot(w1_ref[...], taps(x), preferred_element_type=jnp.float32))
    # Dropout2d: identity in eval mode.
    # TODO(synk): training-mode channelwise Dropout2d (pltpu.prng_*) not emitted.

    # Layer 2: h1 stays resident in VMEM/vregs (no HBM round-trip).
    h2 = instnorm_lrelu(
        jnp.dot(w2_ref[...], taps(h1), preferred_element_type=jnp.float32))

    o_ref[...] = h2.astype(o_ref.dtype)


def _tap_masks(h, w):
    """(9, h*w) float mask: 1.0 where 3x3 tap (dy, dx) reads inside the image."""
    hh, ww = jnp.meshgrid(jnp.arange(h), jnp.arange(w), indexing="ij")
    hh = hh.reshape(-1)
    ww = ww.reshape(-1)
    masks = []
    for dy in range(3):
        for dx in range(3):
            valid = ((hh + dy - 1 >= 0) & (hh + dy - 1 < h) &
                     (ww + dx - 1 >= 0) & (ww + dx - 1 < w))
            masks.append(valid)
    return jnp.stack(masks, axis=0).astype(jnp.float32)


def conv_block_forward(x_nchw, w1_hwio, w2_hwio):
    """ConvBlock.forward (dims=2, eval): NCHW in -> NCHW out."""
    n, cin, h, w = x_nchw.shape
    cout = w1_hwio.shape[-1]
    hw = h * w

    x_cm = x_nchw.reshape(n, cin, hw)                  # channel-major, free reshape
    masks = _tap_masks(h, w)                           # (9, hw), resident in VMEM
    w1t = w1_hwio.reshape(9 * cin, cout).T             # (cout, 9*cin) single slab
    w2t = w2_hwio.reshape(9 * cout, cout).T            # (cout, 9*cout)

    kernel = functools.partial(_conv_block_kernel, H=h, W=w)

    # TODO(synk): at real UNet sizes (large H*W) add a spatial grid axis
    # ("arbitrary", last) with two-pass InstanceNorm accumulation and an
    # explicit vmem_limit_bytes so whole-image blocks also fit v7x's 64 MiB VMEM.
    out = pl.pallas_call(
        kernel,
        out_shape=jax.ShapeDtypeStruct((n, cout, hw), x_nchw.dtype),
        grid=(n,),
        in_specs=[
            pl.BlockSpec((None, cin, hw), lambda i: (i, 0, 0)),
            pl.BlockSpec((9, hw), lambda i: (0, 0)),          # resident across grid
            pl.BlockSpec((cout, 9 * cin), lambda i: (0, 0)),
            pl.BlockSpec((cout, 9 * cout), lambda i: (0, 0)),
        ],
        out_specs=pl.BlockSpec((None, cout, hw), lambda i: (i, 0, 0)),
        compiler_params=pltpu.CompilerParams(
            dimension_semantics=("parallel",)),               # feeds both TCs on v7x
    )(x_cm, masks, w1t, w2t)

    return out.reshape(n, cout, h, w)


# --------------------------- pure-JAX reference ----------------------------

def _reference_layer(x_nhwc, w_hwio):
    y = jax.lax.conv_general_dilated(
        x_nhwc, w_hwio, window_strides=(1, 1), padding="SAME",
        dimension_numbers=("NHWC", "HWIO", "NHWC"))
    mean = jnp.mean(y, axis=(1, 2), keepdims=True)
    var = jnp.var(y, axis=(1, 2), keepdims=True)
    y = (y - mean) * jax.lax.rsqrt(var + EPS)
    return jnp.where(y > 0, y, NEG_SLOPE * y)


def _reference_block(x_nchw, w1, w2):
    x = jnp.transpose(x_nchw, (0, 2, 3, 1))
    h = _reference_layer(_reference_layer(x, w1), w2)
    return jnp.transpose(h, (0, 3, 1, 2))


if __name__ == "__main__":
    # ConvBlock(in_chans=4, out_chans=8, drop_prob=0.0, dims=2), eval mode.
    N, CIN, COUT, H, W = 2, 4, 8, 16, 16

    key = jax.random.PRNGKey(0)
    kx, kw1, kw2 = jax.random.split(key, 3)

    x = jax.random.normal(kx, (N, CIN, H, W), dtype=jnp.float32)        # NCHW
    # Deterministic synthetic conv weights (HWIO layout), no bias (bias=False).
    w1 = jax.random.normal(kw1, (3, 3, CIN, COUT), dtype=jnp.float32) * 0.1
    w2 = jax.random.normal(kw2, (3, 3, COUT, COUT), dtype=jnp.float32) * 0.1

    out = jax.block_until_ready(jax.jit(conv_block_forward)(x, w1, w2))

    ref = jax.block_until_ready(_reference_block(x, w1, w2))
    assert out.shape == (N, COUT, H, W)
    max_err = float(jnp.max(jnp.abs(out - ref)))
    assert max_err < 1e-3, f"mismatch vs reference: {max_err}"

    print("KERNEL_OK")
</pallas_src>

<mosaic_0001>
module attributes {stable_mosaic.version = 11 : i64} {
  func.func @_conv_block_kernel(%arg0: i32, %arg1: memref<1x4x256xf32, #tpu.memory_space<vmem>>, %arg2: memref<9x256xf32, #tpu.memory_space<vmem>>, %arg3: memref<8x36xf32, #tpu.memory_space<vmem>>, %arg4: memref<8x72xf32, #tpu.memory_space<vmem>>, %arg5: memref<1x8x256xf32, #tpu.memory_space<vmem>>) attributes {dimension_semantics = [#tpu.dimension_semantics<parallel>], iteration_bounds = array<i64: 2>, scalar_prefetch = 0 : i64, scratch_operands = 0 : i64, tpu.core_type = #tpu.core_type<tc>, window_params = [{transform_indices = @transform_0, window_bounds = array<i64: 1, 4, 256>}, {pipeline_mode = #tpu.pipeline_mode<synchronous>, transform_indices = @transform_1, window_bounds = array<i64: 9, 256>}, {pipeline_mode = #tpu.pipeline_mode<synchronous>, transform_indices = @transform_2, window_bounds = array<i64: 8, 36>}, {pipeline_mode = #tpu.pipeline_mode<synchronous>, transform_indices = @transform_3, window_bounds = array<i64: 8, 72>}, {transform_indices = @transform_4, window_bounds = array<i64: 1, 8, 256>}]} {
    %c0 = arith.constant 0 : index
    %c0_0 = arith.constant 0 : index
    %c0_1 = arith.constant 0 : index
    %0 = vector.load %arg1[%c0, %c0_0, %c0_1] : memref<1x4x256xf32, #tpu.memory_space<vmem>>, vector<1x4x256xf32>
    %1 = vector.shape_cast %0 : vector<1x4x256xf32> to vector<4x256xf32>
    %c0_2 = arith.constant 0 : index
    %c0_3 = arith.constant 0 : index
    %2 = vector.load %arg3[%c0_2, %c0_3] : memref<8x36xf32, #tpu.memory_space<vmem>>, vector<8x36xf32>
    %3 = vector.extract_strided_slice %1 {offsets = [0, 239], sizes = [4, 17], strides = [1, 1]} : vector<4x256xf32> to vector<4x17xf32>
    %4 = vector.extract_strided_slice %1 {offsets = [0, 0], sizes = [4, 239], strides = [1, 1]} : vector<4x256xf32> to vector<4x239xf32>
    %5 = tpu.concatenate %3, %4 in 1 : vector<4x17xf32>, vector<4x239xf32> -> vector<4x256xf32>
    %c0_4 = arith.constant 0 : index
    %c0_5 = arith.constant 0 : index
    %6 = vector.load %arg2[%c0_4, %c0_5] : memref<9x256xf32, #tpu.memory_space<vmem>>, vector<1x256xf32>
    %7 = vector.broadcast %6 : vector<1x256xf32> to vector<4x256xf32>
    %8 = arith.mulf %5, %7 : vector<4x256xf32>
    %9 = vector.extract_strided_slice %1 {offsets = [0, 240], sizes = [4, 16], strides = [1, 1]} : vector<4x256xf32> to vector<4x16xf32>
    %10 = vector.extract_strided_slice %1 {offsets = [0, 0], sizes = [4, 240], strides = [1, 1]} : vector<4x256xf32> to vector<4x240xf32>
    %11 = tpu.concatenate %9, %10 in 1 : vector<4x16xf32>, vector<4x240xf32> -> vector<4x256xf32>
    %c1 = arith.constant 1 : index
    %c0_6 = arith.constant 0 : index
    %12 = vector.load %arg2[%c1, %c0_6] : memref<9x256xf32, #tpu.memory_space<vmem>>, vector<1x256xf32>
    %13 = vector.broadcast %12 : vector<1x256xf32> to vector<4x256xf32>
    %14 = arith.mulf %11, %13 : vector<4x256xf32>
    %15 = vector.extract_strided_slice %1 {offsets = [0, 241], sizes = [4, 15], strides = [1, 1]} : vector<4x256xf32> to vector<4x15xf32>
    %16 = vector.extract_strided_slice %1 {offsets = [0, 0], sizes = [4, 241], strides = [1, 1]} : vector<4x256xf32> to vector<4x241xf32>
    %17 = tpu.concatenate %15, %16 in 1 : vector<4x15xf32>, vector<4x241xf32> -> vector<4x256xf32>
    %c2 = arith.constant 2 : index
    %c0_7 = arith.constant 0 : index
    %18 = vector.load %arg2[%c2, %c0_7] : memref<9x256xf32, #tpu.memory_space<vmem>>, vector<1x256xf32>
    %19 = vector.broadcast %18 : vector<1x256xf32> to vector<4x256xf32>
    %20 = arith.mulf %17, %19 : vector<4x256xf32>
    %21 = vector.extract_strided_slice %1 {offsets = [0, 255], sizes = [4, 1], strides = [1, 1]} : vector<4x256xf32> to vector<4x1xf32>
    %22 = vector.extract_strided_slice %1 {offsets = [0, 0], sizes = [4, 255], strides = [1, 1]} : vector<4x256xf32> to vector<4x255xf32>
    %23 = tpu.concatenate %21, %22 in 1 : vector<4x1xf32>, vector<4x255xf32> -> vector<4x256xf32>
    %c3 = arith.constant 3 : index
    %c0_8 = arith.constant 0 : index
    %24 = vector.load %arg2[%c3, %c0_8] : memref<9x256xf32, #tpu.memory_space<vmem>>, vector<1x256xf32>
    %25 = vector.broadcast %24 : vector<1x256xf32> to vector<4x256xf32>
    %26 = arith.mulf %23, %25 : vector<4x256xf32>
    %27 = vector.extract_strided_slice %1 {offsets = [0, 1], sizes = [4, 255], strides = [1, 1]} : vector<4x256xf32> to vector<4x255xf32>
    %28 = vector.extract_strided_slice %1 {offsets = [0, 0], sizes = [4, 1], strides = [1, 1]} : vector<4x256xf32> to vector<4x1xf32>
    %29 = tpu.concatenate %27, %28 in 1 : vector<4x255xf32>, vector<4x1xf32> -> vector<4x256xf32>
    %c5 = arith.constant 5 : index
    %c0_9 = arith.constant 0 : index
    %30 = vector.load %arg2[%c5, %c0_9] : memref<9x256xf32, #tpu.memory_space<vmem>>, vector<1x256xf32>
    %31 = vector.broadcast %30 : vector<1x256xf32> to vector<4x256xf32>
    %32 = arith.mulf %29, %31 : vector<4x256xf32>
    %33 = vector.extract_strided_slice %1 {offsets = [0, 15], sizes = [4, 241], strides = [1, 1]} : vector<4x256xf32> to vector<4x241xf32>
    %34 = vector.extract_strided_slice %1 {offsets = [0, 0], sizes = [4, 15], strides = [1, 1]} : vector<4x256xf32> to vector<4x15xf32>
    %35 = tpu.concatenate %33, %34 in 1 : vector<4x241xf32>, vector<4x15xf32> -> vector<4x256xf32>
    %c6 = arith.constant 6 : index
    %c0_10 = arith.constant 0 : index
    %36 = vector.load %arg2[%c6, %c0_10] : memref<9x256xf32, #tpu.memory_space<vmem>>, vector<1x256xf32>
    %37 = vector.broadcast %36 : vector<1x256xf32> to vector<4x256xf32>
    %38 = arith.mulf %35, %37 : vector<4x256xf32>
    %39 = vector.extract_strided_slice %1 {offsets = [0, 16], sizes = [4, 240], strides = [1, 1]} : vector<4x256xf32> to vector<4x240xf32>
    %40 = vector.extract_strided_slice %1 {offsets = [0, 0], sizes = [4, 16], strides = [1, 1]} : vector<4x256xf32> to vector<4x16xf32>
    %41 = tpu.concatenate %39, %40 in 1 : vector<4x240xf32>, vector<4x16xf32> -> vector<4x256xf32>
    %c7 = arith.constant 7 : index
    %c0_11 = arith.constant 0 : index
    %42 = vector.load %arg2[%c7, %c0_11] : memref<9x256xf32, #tpu.memory_space<vmem>>, vector<1x256xf32>
    %43 = vector.broadcast %42 : vector<1x256xf32> to vector<4x256xf32>
    %44 = arith.mulf %41, %43 : vector<4x256xf32>
    %45 = vector.extract_strided_slice %1 {offsets = [0, 17], sizes = [4, 239], strides = [1, 1]} : vector<4x256xf32> to vector<4x239xf32>
    %46 = vector.extract_strided_slice %1 {offsets = [0, 0], sizes = [4, 17], strides = [1, 1]} : vector<4x256xf32> to vector<4x17xf32>
    %47 = tpu.concatenate %45, %46 in 1 : vector<4x239xf32>, vector<4x17xf32> -> vector<4x256xf32>
    %c8 = arith.constant 8 : index
    %c0_12 = arith.constant 0 : index
    %48 = vector.load %arg2[%c8, %c0_12] : memref<9x256xf32, #tpu.memory_space<vmem>>, vector<1x256xf32>
    %49 = vector.broadcast %48 : vector<1x256xf32> to vector<4x256xf32>
    %50 = arith.mulf %47, %49 : vector<4x256xf32>
    %51 = tpu.concatenate %8, %14, %20, %26, %1, %32, %38, %44, %50 in 0 : vector<4x256xf32>, vector<4x256xf32>, vector<4x256xf32>, vector<4x256xf32>, vector<4x256xf32>, vector<4x256xf32>, vector<4x256xf32>, vector<4x256xf32>, vector<4x256xf32> -> vector<36x256xf32>
    %cst = arith.constant dense<0.000000e+00> : vector<8x256xf32>
    %52 = tpu.matmul %2, %51, %cst {dimension_numbers = #tpu.dot_dimension_numbers<[1], [0], [0], [1], [0, 0, 1, 1], [], []>} : vector<8x36xf32>, vector<36x256xf32>, vector<8x256xf32> -> vector<8x256xf32>
    %cst_13 = arith.constant dense<0.000000e+00> : vector<8xf32>
    %53 = vector.multi_reduction <add>, %52, %cst_13 [1] : vector<8x256xf32> to vector<8xf32>
    %54 = vector.shape_cast %53 : vector<8xf32> to vector<8x1xf32>
    %55 = arith.mulf %52, %52 : vector<8x256xf32>
    %cst_14 = arith.constant dense<0.000000e+00> : vector<8xf32>
    %56 = vector.multi_reduction <add>, %55, %cst_14 [1] : vector<8x256xf32> to vector<8xf32>
    %57 = vector.shape_cast %56 : vector<8xf32> to vector<8x1xf32>
    %cst_15 = arith.constant 3.906250e-03 : f32
    %58 = vector.broadcast %cst_15 : f32 to vector<8x1xf32>
    %59 = arith.mulf %54, %58 : vector<8x1xf32>
    %cst_16 = arith.constant 3.906250e-03 : f32
    %60 = vector.broadcast %cst_16 : f32 to vector<8x1xf32>
    %61 = arith.mulf %57, %60 : vector<8x1xf32>
    %62 = arith.mulf %59, %59 : vector<8x1xf32>
    %63 = arith.subf %61, %62 : vector<8x1xf32>
    %cst_17 = arith.constant 0.000000e+00 : f32
    %64 = vector.broadcast %cst_17 : f32 to vector<8x1xf32>
    %65 = arith.maximumf %63, %64 : vector<8x1xf32>
    %66 = vector.broadcast %59 : vector<8x1xf32> to vector<8x256xf32>
    %67 = arith.subf %52, %66 : vector<8x256xf32>
    %cst_18 = arith.constant 9.99999974E-6 : f32
    %68 = vector.broadcast %cst_18 : f32 to vector<8x1xf32>
    %69 = arith.addf %65, %68 : vector<8x1xf32>
    %70 = math.rsqrt %69 : vector<8x1xf32>
    %71 = vector.broadcast %70 : vector<8x1xf32> to vector<8x256xf32>
    %72 = arith.mulf %67, %71 : vector<8x256xf32>
    %cst_19 = arith.constant 0.000000e+00 : f32
    %73 = vector.broadcast %cst_19 : f32 to vector<8x256xf32>
    %74 = arith.cmpf ogt, %72, %73 : vector<8x256xf32>
    %cst_20 = arith.constant 2.000000e-01 : f32
    %75 = vector.broadcast %cst_20 : f32 to vector<8x256xf32>
    %76 = arith.mulf %75, %72 : vector<8x256xf32>
    %77 = arith.select %74, %72, %76 : vector<8x256xi1>, vector<8x256xf32>
    %c0_21 = arith.constant 0 : index
    %c0_22 = arith.constant 0 : index
    %78 = vector.load %arg4[%c0_21, %c0_22] : memref<8x72xf32, #tpu.memory_space<vmem>>, vector<8x72xf32>
    %79 = vector.extract_strided_slice %77 {offsets = [0, 239], sizes = [8, 17], strides = [1, 1]} : vector<8x256xf32> to vector<8x17xf32>
    %80 = vector.extract_strided_slice %77 {offsets = [0, 0], sizes = [8, 239], strides = [1, 1]} : vector<8x256xf32> to vector<8x239xf32>
    %81 = tpu.concatenate %79, %80 in 1 : vector<8x17xf32>, vector<8x239xf32> -> vector<8x256xf32>
    %c0_23 = arith.constant 0 : index
    %c0_24 = arith.constant 0 : index
    %82 = vector.load %arg2[%c0_23, %c0_24] : memref<9x256xf32, #tpu.memory_space<vmem>>, vector<1x256xf32>
    %83 = vector.broadcast %82 : vector<1x256xf32> to vector<8x256xf32>
    %84 = arith.mulf %81, %83 : vector<8x256xf32>
    %85 = vector.extract_strided_slice %77 {offsets = [0, 240], sizes = [8, 16], strides = [1, 1]} : vector<8x256xf32> to vector<8x16xf32>
    %86 = vector.extract_strided_slice %77 {offsets = [0, 0], sizes = [8, 240], strides = [1, 1]} : vector<8x256xf32> to vector<8x240xf32>
    %87 = tpu.concatenate %85, %86 in 1 : vector<8x16xf32>, vector<8x240xf32> -> vector<8x256xf32>
    %c1_25 = arith.constant 1 : index
    %c0_26 = arith.constant 0 : index
    %88 = vector.load %arg2[%c1_25, %c0_26] : memref<9x256xf32, #tpu.memory_space<vmem>>, vector<1x256xf32>
    %89 = vector.broadcast %88 : vector<1x256xf32> to vector<8x256xf32>
    %90 = arith.mulf %87, %89 : vector<8x256xf32>
    %91 = vector.extract_strided_slice %77 {offsets = [0, 241], sizes = [8, 15], strides = [1, 1]} : vector<8x256xf32> to vector<8x15xf32>
    %92 = vector.extract_strided_slice %77 {offsets = [0, 0], sizes = [8, 241], strides = [1, 1]} : vector<8x256xf32> to vector<8x241xf32>
    %93 = tpu.concatenate %91, %92 in 1 : vector<8x15xf32>, vector<8x241xf32> -> vector<8x256xf32>
    %c2_27 = arith.constant 2 : index
    %c0_28 = arith.constant 0 : index
    %94 = vector.load %arg2[%c2_27, %c0_28] : memref<9x256xf32, #tpu.memory_space<vmem>>, vector<1x256xf32>
    %95 = vector.broadcast %94 : vector<1x256xf32> to vector<8x256xf32>
    %96 = arith.mulf %93, %95 : vector<8x256xf32>
    %97 = vector.extract_strided_slice %77 {offsets = [0, 255], sizes = [8, 1], strides = [1, 1]} : vector<8x256xf32> to vector<8x1xf32>
    %98 = vector.extract_strided_slice %77 {offsets = [0, 0], sizes = [8, 255], strides = [1, 1]} : vector<8x256xf32> to vector<8x255xf32>
    %99 = tpu.concatenate %97, %98 in 1 : vector<8x1xf32>, vector<8x255xf32> -> vector<8x256xf32>
    %c3_29 = arith.constant 3 : index
    %c0_30 = arith.constant 0 : index
    %100 = vector.load %arg2[%c3_29, %c0_30] : memref<9x256xf32, #tpu.memory_space<vmem>>, vector<1x256xf32>
    %101 = vector.broadcast %100 : vector<1x256xf32> to vector<8x256xf32>
    %102 = arith.mulf %99, %101 : vector<8x256xf32>
    %103 = vector.extract_strided_slice %77 {offsets = [0, 1], sizes = [8, 255], strides = [1, 1]} : vector<8x256xf32> to vector<8x255xf32>
    %104 = vector.extract_strided_slice %77 {offsets = [0, 0], sizes = [8, 1], strides = [1, 1]} : vector<8x256xf32> to vector<8x1xf32>
    %105 = tpu.concatenate %103, %104 in 1 : vector<8x255xf32>, vector<8x1xf32> -> vector<8x256xf32>
    %c5_31 = arith.constant 5 : index
    %c0_32 = arith.constant 0 : index
    %106 = vector.load %arg2[%c5_31, %c0_32] : memref<9x256xf32, #tpu.memory_space<vmem>>, vector<1x256xf32>
    %107 = vector.broadcast %106 : vector<1x256xf32> to vector<8x256xf32>
    %108 = arith.mulf %105, %107 : vector<8x256xf32>
    %109 = vector.extract_strided_slice %77 {offsets = [0, 15], sizes = [8, 241], strides = [1, 1]} : vector<8x256xf32> to vector<8x241xf32>
    %110 = vector.extract_strided_slice %77 {offsets = [0, 0], sizes = [8, 15], strides = [1, 1]} : vector<8x256xf32> to vector<8x15xf32>
    %111 = tpu.concatenate %109, %110 in 1 : vector<8x241xf32>, vector<8x15xf32> -> vector<8x256xf32>
    %c6_33 = arith.constant 6 : index
    %c0_34 = arith.constant 0 : index
    %112 = vector.load %arg2[%c6_33, %c0_34] : memref<9x256xf32, #tpu.memory_space<vmem>>, vector<1x256xf32>
    %113 = vector.broadcast %112 : vector<1x256xf32> to vector<8x256xf32>
    %114 = arith.mulf %111, %113 : vector<8x256xf32>
    %115 = vector.extract_strided_slice %77 {offsets = [0, 16], sizes = [8, 240], strides = [1, 1]} : vector<8x256xf32> to vector<8x240xf32>
    %116 = vector.extract_strided_slice %77 {offsets = [0, 0], sizes = [8, 16], strides = [1, 1]} : vector<8x256xf32> to vector<8x16xf32>
    %117 = tpu.concatenate %115, %116 in 1 : vector<8x240xf32>, vector<8x16xf32> -> vector<8x256xf32>
    %c7_35 = arith.constant 7 : index
    %c0_36 = arith.constant 0 : index
    %118 = vector.load %arg2[%c7_35, %c0_36] : memref<9x256xf32, #tpu.memory_space<vmem>>, vector<1x256xf32>
    %119 = vector.broadcast %118 : vector<1x256xf32> to vector<8x256xf32>
    %120 = arith.mulf %117, %119 : vector<8x256xf32>
    %121 = vector.extract_strided_slice %77 {offsets = [0, 17], sizes = [8, 239], strides = [1, 1]} : vector<8x256xf32> to vector<8x239xf32>
    %122 = vector.extract_strided_slice %77 {offsets = [0, 0], sizes = [8, 17], strides = [1, 1]} : vector<8x256xf32> to vector<8x17xf32>
    %123 = tpu.concatenate %121, %122 in 1 : vector<8x239xf32>, vector<8x17xf32> -> vector<8x256xf32>
    %c8_37 = arith.constant 8 : index
    %c0_38 = arith.constant 0 : index
    %124 = vector.load %arg2[%c8_37, %c0_38] : memref<9x256xf32, #tpu.memory_space<vmem>>, vector<1x256xf32>
    %125 = vector.broadcast %124 : vector<1x256xf32> to vector<8x256xf32>
    %126 = arith.mulf %123, %125 : vector<8x256xf32>
    %127 = tpu.concatenate %84, %90, %96, %102, %77, %108, %114, %120, %126 in 0 : vector<8x256xf32>, vector<8x256xf32>, vector<8x256xf32>, vector<8x256xf32>, vector<8x256xf32>, vector<8x256xf32>, vector<8x256xf32>, vector<8x256xf32>, vector<8x256xf32> -> vector<72x256xf32>
    %cst_39 = arith.constant dense<0.000000e+00> : vector<8x256xf32>
    %128 = tpu.matmul %78, %127, %cst_39 {dimension_numbers = #tpu.dot_dimension_numbers<[1], [0], [0], [1], [0, 0, 1, 1], [], []>} : vector<8x72xf32>, vector<72x256xf32>, vector<8x256xf32> -> vector<8x256xf32>
    %cst_40 = arith.constant dense<0.000000e+00> : vector<8xf32>
    %129 = vector.multi_reduction <add>, %128, %cst_40 [1] : vector<8x256xf32> to vector<8xf32>
    %130 = vector.shape_cast %129 : vector<8xf32> to vector<8x1xf32>
    %131 = arith.mulf %128, %128 : vector<8x256xf32>
    %cst_41 = arith.constant dense<0.000000e+00> : vector<8xf32>
    %132 = vector.multi_reduction <add>, %131, %cst_41 [1] : vector<8x256xf32> to vector<8xf32>
    %133 = vector.shape_cast %132 : vector<8xf32> to vector<8x1xf32>
    %cst_42 = arith.constant 3.906250e-03 : f32
    %134 = vector.broadcast %cst_42 : f32 to vector<8x1xf32>
    %135 = arith.mulf %130, %134 : vector<8x1xf32>
    %cst_43 = arith.constant 3.906250e-03 : f32
    %136 = vector.broadcast %cst_43 : f32 to vector<8x1xf32>
    %137 = arith.mulf %133, %136 : vector<8x1xf32>
    %138 = arith.mulf %135, %135 : vector<8x1xf32>
    %139 = arith.subf %137, %138 : vector<8x1xf32>
    %cst_44 = arith.constant 0.000000e+00 : f32
    %140 = vector.broadcast %cst_44 : f32 to vector<8x1xf32>
    %141 = arith.maximumf %139, %140 : vector<8x1xf32>
    %142 = vector.broadcast %135 : vector<8x1xf32> to vector<8x256xf32>
    %143 = arith.subf %128, %142 : vector<8x256xf32>
    %cst_45 = arith.constant 9.99999974E-6 : f32
    %144 = vector.broadcast %cst_45 : f32 to vector<8x1xf32>
    %145 = arith.addf %141, %144 : vector<8x1xf32>
    %146 = math.rsqrt %145 : vector<8x1xf32>
    %147 = vector.broadcast %146 : vector<8x1xf32> to vector<8x256xf32>
    %148 = arith.mulf %143, %147 : vector<8x256xf32>
    %cst_46 = arith.constant 0.000000e+00 : f32
    %149 = vector.broadcast %cst_46 : f32 to vector<8x256xf32>
    %150 = arith.cmpf ogt, %148, %149 : vector<8x256xf32>
    %cst_47 = arith.constant 2.000000e-01 : f32
    %151 = vector.broadcast %cst_47 : f32 to vector<8x256xf32>
    %152 = arith.mulf %151, %148 : vector<8x256xf32>
    %153 = arith.select %150, %148, %152 : vector<8x256xi1>, vector<8x256xf32>
    %c0_48 = arith.constant 0 : index
    %c0_49 = arith.constant 0 : index
    %c0_50 = arith.constant 0 : index
    %154 = vector.load %arg5[%c0_48, %c0_49, %c0_50] : memref<1x8x256xf32, #tpu.memory_space<vmem>>, vector<1x8x256xf32>
    %155 = vector.shape_cast %154 : vector<1x8x256xf32> to vector<8x256xf32>
    %156 = vector.shape_cast %153 : vector<8x256xf32> to vector<1x8x256xf32>
    tpu.vector_store %arg5[%c0_48, %c0_49, %c0_50], %156 {strides = array<i32>} : memref<1x8x256xf32, #tpu.memory_space<vmem>>, vector<1x8x256xf32>,
    return
  }
  func.func @transform_0(%arg0: i32) -> (i32, i32, i32) {
    %c0_i32 = arith.constant 0 : i32
    %c0_i32_0 = arith.constant 0 : i32
    %c0_i32_1 = arith.constant 0 : i32
    return %arg0, %c0_i32, %c0_i32_0 : i32, i32, i32
  }
  func.func @transform_1(%arg0: i32) -> (i32, i32) {
    %c0_i32 = arith.constant 0 : i32
    %c0_i32_0 = arith.constant 0 : i32
    %c0_i32_1 = arith.constant 0 : i32
    return %c0_i32, %c0_i32_0 : i32, i32
  }
  func.func @transform_2(%arg0: i32) -> (i32, i32) {
    %c0_i32 = arith.constant 0 : i32
    %c0_i32_0 = arith.constant 0 : i32
    %c0_i32_1 = arith.constant 0 : i32
    return %c0_i32, %c0_i32_0 : i32, i32
  }
  func.func @transform_3(%arg0: i32) -> (i32, i32) {
    %c0_i32 = arith.constant 0 : i32
    %c0_i32_0 = arith.constant 0 : i32
    %c0_i32_1 = arith.constant 0 : i32
    return %c0_i32, %c0_i32_0 : i32, i32
  }
  func.func @transform_4(%arg0: i32) -> (i32, i32, i32) {
    %c0_i32 = arith.constant 0 : i32
    %c0_i32_0 = arith.constant 0 : i32
    %c0_i32_1 = arith.constant 0 : i32
    return %arg0, %c0_i32, %c0_i32_0 : i32, i32, i32
  }
}

</mosaic_0001>

<bundles_post_ra>
// kernel: conv_block_forward.1
= control target key start
LH: loop header
LB: loop body
LE: loop exit
PB: predicated region body
PF: predicated region fallthrough
CT: control target
= control target key end

     0   :  { %s901_s15 = smov 0   ;;  %s1145_s0 = inlined_call_operand.vmem [shape: f32[2,4,256], index: 0, kind: input, shape index: {}]   ;;  %s1146_s1 = inlined_call_operand.vmem [shape: f32[9,256], index: 1, kind: input, shape index: {}]   ;;  %s1147_s2 = inlined_call_operand.vmem [shape: f32[8,36], index: 2, kind: input, shape index: {}]   ;;  %s1148_s3 = inlined_call_operand.vmem [shape: f32[8,72], index: 3, kind: input, shape index: {}]   ;;  %s1149_s4 = inlined_call_operand.vmem [shape: f32[2,8,256], index: 4, kind: output, shape index: {}]  }
   0x1 LB: > { %s789_s16 = sadd.s32 4294967295, %s865_s15   ;;  %p793_p0 = scmp.ge.s32.totalorder %s865_s15, 1  ;;  %s865_s15 = sphi %s901_s15, %s14_s15  }
   0x2   : > { %p162_p1 = scmp.lt.s32.totalorder %s865_s15, 3 }
   0x4   : > { %p163_p2 = pnand %p793_p0, %p162_p1 }
   0x5   : > { %p188_p3 = scmp.lt.s32.totalorder (!%p163_p2), %s789_s16, 1  ;;  %s867_s21 = smov (!%p163_p2), 1   ;;  %v873_v2 = vmov (!%p163_p2), 0.0   ;;  %v214_v3 = vlaneseq (!%p163_p2)  ;;  %v798_v9 = vld [vmem:[%s1146_s1 + $0x1] ss:$8 sm:$0x3] (!%p163_p2) }
   0x6   : > { %166 = sbr.rel (%p163_p2) target bundleno = 1085 (0x43d), region = 36  ;;  %s868_s22 = smov (!%p163_p2), 16   ;;  %509 = vmatprep.mubr.f32.mxu0 (!%p163_p2), %v873_v2  ;;  %700 = vmatprep.mubr.f32.mxu1 (!%p163_p2), %v873_v2  ;;  %vm231_vm0 = vcmask (!%p163_p2), 130048   ;;  %v800_v10 = vld [vmem:[%s1146_s1 + $0x3] ss:$8 sm:$0x3] (!%p163_p2) }
   0x7   : > { %s869_s23 = smov (!%p163_p2), 17   ;;  %s870_s24 = smov (!%p163_p2), 15   ;;  %v215_v4 = vshrl.u32 (!%p163_p2), %v214_v3, 7  ;;  %v212_v17 = vld [vmem:[%s1146_s1] ss:$8 sm:$0x3] (!%p163_p2) }
   0x8   : > { %s871_s25 = smov (!%p163_p2), 127   ;;  %s872_s26 = smov (!%p163_p2), 112   ;;  %vm281_vm1 = vcmask (!%p163_p2), 7168   ;;  %vm207_vm2 = vcmask (!%p163_p2), 138240   ;;  %vm256_vm3 = vcmask (!%p163_p2), 121856   ;;  %vm305_vm4 = vcmask (!%p163_p2), 1039360  }
   0x9   : > { %s874_s27 = smov (!%p163_p2), 113   ;;  %s875_s28 = smov (!%p163_p2), 111   ;;  %v953_v7 = vsub.s32 (!%p163_p2), 0, %v215_v4  ;;  %v955_v8 = vsub.s32 (!%p163_p2), 1, %v215_v4  ;;  %vm426_vm5 = vcmask (!%p163_p2), 1043456   ;;  %vm355_vm6 = vcmask (!%p163_p2), 916480  }
   0xa   : > { %v799_v20 = vld [vmem:[%s1146_s1 + $0x2] ss:$8 sm:$0x3] (!%p163_p2)  ;;  %v801_v39 = vld [vmem:[%s1146_s1 + $0x5] ss:$8 sm:$0x3] (!%p163_p2) }
   0xb   : > { %v964_v12 = vrot.slane (!%p163_p2), %v798_v9, %v953_v7  ;;  %v967_v13 = vrot.slane (!%p163_p2), %v798_v9, %v955_v8  ;;  %v975_v18 = vrot.slane (!%p163_p2), %v800_v10, %v953_v7  ;;  %v978_v19 = vrot.slane (!%p163_p2), %v800_v10, %v955_v8  ;;  %v803_v50 = vld [vmem:[%s1146_s1 + $0x7] ss:$8 sm:$0x3] (!%p163_p2)  ;;  %v802_v63 = vld [vmem:[%s1146_s1 + $0x6] ss:$8 sm:$0x3] (!%p163_p2) }
   0xc   : > { %v986_v24 = vrot.slane (!%p163_p2), %v212_v17, %v953_v7  ;;  %v989_v25 = vrot.slane (!%p163_p2), %v212_v17, %v955_v8  ;;  %v998_v33 = vrot.slane (!%p163_p2), %v799_v20, %v953_v7  ;;  %v1001_v34 = vrot.slane (!%p163_p2), %v799_v20, %v955_v8 }
   0xd   : > { %s1151_s16 = smov (!%p188_p3, %s789_s16), 1  ;;  %v1013_v48 = vrot.slane %v801_v39, %v953_v7  ;;  %v1016_v49 = vrot.slane %v801_v39, %v955_v8  ;;  %v1028_v61 = vrot.slane %v803_v50, %v953_v7  ;;  %v1031_v62 = vrot.slane %v803_v50, %v955_v8 }
   0xe   : > { %s811_s17 = sshll.u32 %s1151_s16, 3  ;;  %vm330_vm7 = vcmask 924672   ;;  %vm380_vm8 = vcmask 908288   ;;  %vm435_vm9 = vcmask 293888   ;;  %vm632_vm12 = vcmask 588800  }
   0xf   : > { %s192_s20 = scalar_lea.vmem %s1145_s0, %s811_s17 }
  0x10   : > { %v915_v0 = vld [vmem:[%s192_s20] sm:$0xff] }
  0x11   : > { %279 = vrot.lane.b32.xlu1 %v915_v0, %s867_s21  ;;  %229 = vrot.lane.b32.xlu0 %v915_v0, %s868_s22  ;;  %v923_v1 = vcombine.high %v915_v0, %v915_v0 }
  0x15   : > { %205 = vrot.lane.b32.xlu1 %v915_v0, %s869_s23  ;;  %226 = vrot.lane.b32.xlu0 %v923_v1, %s868_s22 }
  0x19   : > { %276 = vrot.lane.b32.xlu1 %v923_v1, %s867_s21  ;;  %202 = vrot.lane.b32.xlu0 %v923_v1, %s869_s23 }
  0x1d   : > { %254 = vrot.lane.b32.xlu1 %v915_v0, %s870_s24  ;;  %251 = vrot.lane.b32.xlu0 %v923_v1, %s870_s24 }
  0x21   : > { %303 = vrot.lane.b32.xlu1 %v923_v1, %s871_s25  ;;  %301 = vrot.lane.b32.xlu0 %v915_v0, %s871_s25 }
  0x25   : > { %353 = vrot.lane.b32.xlu1 %v923_v1, %s872_s26  ;;  %351 = vrot.lane.b32.xlu0 %v915_v0, %s872_s26 }
  0x29   : > { %328 = vrot.lane.b32.xlu1 %v923_v1, %s874_s27  ;;  %326 = vrot.lane.b32.xlu0 %v915_v0, %s874_s27 }
  0x2d   : > { %378 = vrot.lane.b32.xlu1 %v923_v1, %s875_s28  ;;  %376 = vrot.lane.b32.xlu0 %v915_v0, %s875_s28 }
  0x83   : > { %v280_v5 = vpop.permute.xlu1 %279  ;;  %v230_v6 = vpop.permute.xlu0 %229 }
  0x87   : > { %v206_v11 = vpop.permute.xlu1 %205  ;;  %v227_v14 = vpop.permute.xlu0 %226 }
  0x88   : > { %v232_v15 = vsel %vm231_vm0, %v230_v6, %v227_v14  ;;  %v235_v16 = vsel %vm231_vm0, %v227_v14, %v230_v6  ;;  %v1043_v14 = vrot.slane %v802_v63, %v953_v7 }
  0x89   : > { %v249_v21 = vmul.f32 %v964_v12, %v235_v16  ;;  %v250_v22 = vmul.f32 %v967_v13, %v232_v15  ;;  %v1046_v15 = vrot.slane %v802_v63, %v955_v8  ;;  %v804_v16 = vld [vmem:[%s1146_s1 + $0x10] ss:$8 sm:$0x3] }
  0x8b   : > { %v277_v23 = vpop.permute.xlu1 %276  ;;  %v203_v26 = vpop.permute.xlu0 %202  ;;  %v403_v40 = vrot.slane %v249_v21, 4  ;;  %v404_v41 = vrot.slane %v250_v22, 4 }
  0x8c   : > { %v282_v27 = vsel %vm281_vm1, %v280_v5, %v277_v23  ;;  %v285_v28 = vsel %vm281_vm1, %v277_v23, %v280_v5  ;;  %v208_v29 = vsel %vm207_vm2, %v206_v11, %v203_v26  ;;  %v211_v30 = vsel %vm207_vm2, %v203_v26, %v206_v11 }
  0x8d   : > { %v299_v31 = vmul.f32 %v975_v18, %v285_v28  ;;  %v300_v32 = vmul.f32 %v978_v19, %v282_v27  ;;  %v224_v35 = vmul.f32 %v986_v24, %v211_v30  ;;  %v225_v36 = vmul.f32 %v989_v25, %v208_v29 }
  0x8e   : > { %v1054_v27 = vrot.slane %v804_v16, %v955_v8 }
  0x8f   : > { %v255_v37 = vpop.permute.xlu1 %254  ;;  %v252_v38 = vpop.permute.xlu0 %251  ;;  %v409_v44 = vrot.slane %v299_v31, 4  ;;  %v410_v45 = vrot.slane %v300_v32, 4  ;;  %v428_v53 = vsel %vm426_vm5, %v225_v36, %v404_v41  ;;  %v427_v55 = vsel %vm426_vm5, %v224_v35, %v403_v40 }
  0x90   : > { %v257_v42 = vsel %vm256_vm3, %v255_v37, %v252_v38  ;;  %v260_v43 = vsel %vm256_vm3, %v252_v38, %v255_v37  ;;  %v1059_v32 = vrot.slane %v804_v16, %v953_v7 }
  0x91   : > { %v274_v46 = vmul.f32 %v998_v33, %v260_v43  ;;  %v275_v47 = vmul.f32 %v1001_v34, %v257_v42 }
  0x93   : > { %v304_v51 = vpop.permute.xlu1 %303  ;;  %v302_v52 = vpop.permute.xlu0 %301  ;;  %v430_v54 = vsel %vm426_vm5, %v275_v47, %v410_v45  ;;  %v429_v56 = vsel %vm426_vm5, %v274_v46, %v409_v44 }
  0x94   : > { %v306_v57 = vsel %vm305_vm4, %v302_v52, %v304_v51  ;;  %v310_v58 = vsel %vm305_vm4, %v304_v51, %v302_v52  ;;  %v813_v59 = vpack.c.bf16 %v430_v54, %v428_v53  ;;  %v815_v60 = vpack.c.bf16 %v429_v56, %v427_v55 }
  0x95   : > { %v324_v2 = vmul.f32 %v1013_v48, %v306_v57  ;;  %v325_v3 = vmul.f32 %v1016_v49, %v310_v58 }
  0x96   : > { %814 = vmatprep.subr.bf16.mxu0 %v813_v59 }
  0x97   : > { %v354_v4 = vpop.permute.xlu1 %353  ;;  %816 = vmatpush1.bf16.msra.mxu0 %v815_v60  ;;  %v352_v5 = vpop.permute.xlu0 %351  ;;  %v416_v17 = vrot.slane %v324_v2, 4  ;;  %v417_v20 = vrot.slane %v325_v3, 4 }
  0x98   : > { %v356_v6 = vsel %vm355_vm6, %v352_v5, %v354_v4  ;;  %v360_v9 = vsel %vm355_vm6, %v354_v4, %v352_v5 }
  0x99   : > { %v374_v10 = vmul.f32 %v1028_v61, %v356_v6  ;;  %v375_v11 = vmul.f32 %v1031_v62, %v360_v9  ;;  %v432_v36 = vsel %vm426_vm5, %v923_v1, %v417_v20  ;;  %v431_v8 = vsel %vm426_vm5, %v915_v0, %v416_v17  ;;  %v199_v0 = vld [vmem:[%s1147_s2] sm:$0xff] }
  0x9b   : > { %v329_v21 = vpop.permute.xlu1 %328  ;;  %v327_v22 = vpop.permute.xlu0 %326  ;;  %v422_v28 = vrot.slane %v374_v10, 4  ;;  %v423_v29 = vrot.slane %v375_v11, 4 }
  0x9c   : > { %v331_v23 = vsel %vm330_vm7, %v327_v22, %v329_v21  ;;  %v335_v26 = vsel %vm330_vm7, %v329_v21, %v327_v22 }
  0x9d   : > { %v349_v30 = vmul.f32 %v1043_v14, %v331_v23  ;;  %v350_v31 = vmul.f32 %v1046_v15, %v335_v26 }
  0x9f   : > { %v379_v35 = vpop.permute.xlu1 %378  ;;  %v434_v37 = vsel %vm426_vm5, %v350_v31, %v423_v29  ;;  %v377_v38 = vpop.permute.xlu0 %376  ;;  %v433_v39 = vsel %vm426_vm5, %v349_v30, %v422_v28 }
  0xa0   : > { %v817_v40 = vpack.c.bf16 %v434_v37, %v432_v36  ;;  %v381_v41 = vsel %vm380_vm8, %v377_v38, %v379_v35  ;;  %v385_v42 = vsel %vm380_vm8, %v379_v35, %v377_v38  ;;  %v819_v43 = vpack.c.bf16 %v433_v39, %v431_v8 }
  0xa1   : > { %v400_v7 = vmul.f32 %v1054_v27, %v385_v42  ;;  %v399_v44 = vmul.f32 %v1059_v32, %v381_v41 }
  0xa2   : > { %818 = vmatprep.subr.bf16.mxu0 %v817_v40 }
  0xa3   : > { %820 = vmatpush1.bf16.msra.mxu0 %v819_v43 }
  0xa4   : > { %805 = vmatprep.subr.msk.mxu0 %vm426_vm5, %v400_v7 }
  0xa7   : > { %806 = vmatpush1.msk.msra.mxu0 %vm426_vm5, %v399_v44 }
  0xa8   : > { %807 = vmatmul.mubr.msk.f32.vlgmr.msra.gmra.mrb[0].mxu0 %vm435_vm9, %v199_v0 }
 0x17b   : > { %v511_v1 = vpop.f32.mrb[0].mxu0 }
 0x17c   : > { %v513_v45 = vpop.f32.mrb[1].mxu0  ;;  %v519_v46 = vmul.f32 %v511_v1, %v511_v1 }
 0x17d   : > { %v520_v47 = vmul.f32 %v513_v45, %v513_v45  ;;  %v516_v50 = vadd.f32 %v513_v45, %v511_v1 }
 0x17f   : > { %517 = vadd.xlane.f32.xlu0 %v516_v50  ;;  %v521_v51 = vadd.f32 %v520_v47, %v519_v46 }
 0x181   : > { %522 = vadd.xlane.f32.xlu1 %v521_v51 }
 0x20c   : > { %v518_v52 = vpop.xlane.xlu0 %517 }
 0x20d   : > { %v524_v53 = vmul.f32 0.00390625, %v518_v52 }
 0x20e   : > { %v523_v54 = vpop.xlane.xlu1 %522 }
 0x20f   : > { %v525_v55 = vmul.f32 0.00390625, %v523_v54  ;;  %v526_v56 = vmul.f32 %v524_v53, %v524_v53  ;;  %v529_v60 = vsub.f32 %v511_v1, %v524_v53  ;;  %v530_v63 = vsub.f32 %v513_v45, %v524_v53 }
 0x211   : > { %v527_v57 = vsub.f32 %v525_v55, %v526_v56 }
 0x213   : > { %v528_v58 = vmax.f32 %v527_v57, 0.0 }
 0x215   : > { %v531_v59 = vadd.f32 1e-05, %v528_v58 }
 0x217   : > { %855 = vrsqrt.f32 %v531_v59 }
 0x221   : > { %v856_v2 = vpop.eup %855 }
 0x222   : > { %v533_v3 = vmul.f32 %v856_v2, %v529_v60  ;;  %v534_v4 = vmul.f32 %v856_v2, %v530_v63 }
 0x224   : > { %vm535_vm10 = vcmp.gt.f32.partialorder %v533_v3, 0.0  ;;  %vm536_vm11 = vcmp.gt.f32.partialorder %v534_v4, 0.0  ;;  %v537_v5 = vmul.f32 0.2, %v533_v3  ;;  %v538_v6 = vmul.f32 0.2, %v534_v4 }
 0x226   : > { %v1076_v9 = vsel %vm535_vm10, %v533_v3, %v537_v5  ;;  %v540_v10 = vsel %vm536_vm11, %v534_v4, %v538_v6 }
 0x227   : > { %543 = vrot.lane.b32.xlu0 %v540_v10, %s869_s23  ;;  %547 = vrot.lane.b32.xlu1 %v1076_v9, %s869_s23  ;;  %s812_s23 = sshll.u32 %s1151_s16, 4 }
 0x22b   : > { %555 = vrot.lane.b32.xlu0 %v540_v10, %s868_s22  ;;  %558 = vrot.lane.b32.xlu1 %v1076_v9, %s868_s22 }
 0x22f   : > { %566 = vrot.lane.b32.xlu0 %v540_v10, %s870_s24  ;;  %569 = vrot.lane.b32.xlu1 %v1076_v9, %s870_s24 }
 0x233   : > { %577 = vrot.lane.b32.xlu0 %v540_v10, %s867_s21  ;;  %580 = vrot.lane.b32.xlu1 %v1076_v9, %s867_s21 }
 0x237   : > { %588 = vrot.lane.b32.xlu0 %v1076_v9, %s871_s25  ;;  %590 = vrot.lane.b32.xlu1 %v540_v10, %s871_s25 }
 0x23b   : > { %599 = vrot.lane.b32.xlu0 %v1076_v9, %s874_s27  ;;  %601 = vrot.lane.b32.xlu1 %v540_v10, %s874_s27 }
 0x23f   : > { %610 = vrot.lane.b32.xlu0 %v1076_v9, %s872_s26  ;;  %612 = vrot.lane.b32.xlu1 %v540_v10, %s872_s26  ;;  %s197_s26 = scalar_lea.vmem %s1149_s4, %s812_s23 }
 0x243   : > { %621 = vrot.lane.b32.xlu0 %v1076_v9, %s875_s28  ;;  %623 = vrot.lane.b32.xlu1 %v540_v10, %s875_s28 }
 0x299   : > { %v544_v11 = vpop.permute.xlu0 %543  ;;  %v548_v16 = vpop.permute.xlu1 %547 }
 0x29a   : > { %v549_v17 = vsel %vm207_vm2, %v548_v16, %v544_v11  ;;  %v552_v20 = vsel %vm207_vm2, %v544_v11, %v548_v16 }
 0x29b   : > { %v553_v28 = vmul.f32 %v552_v20, %v986_v24  ;;  %v554_v30 = vmul.f32 %v549_v17, %v989_v25 }
 0x29d   : > { %v556_v21 = vpop.permute.xlu0 %555  ;;  %v559_v22 = vpop.permute.xlu1 %558 }
 0x29e   : > { %v560_v23 = vsel %vm231_vm0, %v559_v22, %v556_v21  ;;  %v563_v26 = vsel %vm231_vm0, %v556_v21, %v559_v22 }
 0x29f   : > { %v564_v29 = vmul.f32 %v563_v26, %v964_v12  ;;  %v565_v31 = vmul.f32 %v560_v23, %v967_v13 }
 0x2a1   : > { %v567_v35 = vpop.permute.xlu0 %566  ;;  %v570_v36 = vpop.permute.xlu1 %569  ;;  %v821_v37 = vpack.c.bf16 %v565_v31, %v554_v30  ;;  %v823_v38 = vpack.c.bf16 %v564_v29, %v553_v28 }
 0x2a2   : > { %v571_v8 = vsel %vm256_vm3, %v570_v36, %v567_v35  ;;  %v574_v39 = vsel %vm256_vm3, %v567_v35, %v570_v36 }
 0x2a3   : > { %822 = vmatprep.subr.bf16.mxu1 %v821_v37  ;;  %v575_v25 = vmul.f32 %v574_v39, %v998_v33  ;;  %v576_v13 = vmul.f32 %v571_v8, %v1001_v34 }
 0x2a4   : > { %824 = vmatpush1.bf16.msra.mxu1 %v823_v38 }
 0x2a5   : > { %v578_v40 = vpop.permute.xlu0 %577  ;;  %v581_v41 = vpop.permute.xlu1 %580 }
 0x2a6   : > { %v582_v24 = vsel %vm281_vm1, %v581_v41, %v578_v40  ;;  %v585_v12 = vsel %vm281_vm1, %v578_v40, %v581_v41 }
 0x2a7   : > { %v586_v42 = vmul.f32 %v585_v12, %v975_v18  ;;  %v587_v43 = vmul.f32 %v582_v24, %v978_v19 }
 0x2a9   : > { %v589_v7 = vpop.permute.xlu0 %588  ;;  %v591_v44 = vpop.permute.xlu1 %590  ;;  %v825_v0 = vpack.c.bf16 %v587_v43, %v576_v13  ;;  %v827_v1 = vpack.c.bf16 %v586_v42, %v575_v25 }
 0x2aa   : > { %v592_v45 = vsel %vm305_vm4, %v589_v7, %v591_v44  ;;  %v596_v46 = vsel %vm305_vm4, %v591_v44, %v589_v7 }
 0x2ab   : > { %v597_v47 = vmul.f32 %v592_v45, %v1013_v48  ;;  %v598_v50 = vmul.f32 %v596_v46, %v1016_v49  ;;  %826 = vmatprep.subr.bf16.mxu1 %v825_v0 }
 0x2ac   : > { %828 = vmatpush1.bf16.msra.mxu1 %v827_v1 }
 0x2ad   : > { %v600_v33 = vpop.permute.xlu0 %599  ;;  %v602_v34 = vpop.permute.xlu1 %601  ;;  %v829_v51 = vpack.c.bf16 %v598_v50, %v540_v10  ;;  %v831_v18 = vpack.c.bf16 %v597_v47, %v1076_v9 }
 0x2ae   : > { %v603_v19 = vsel %vm330_vm7, %v600_v33, %v602_v34  ;;  %v607_v52 = vsel %vm330_vm7, %v602_v34, %v600_v33 }
 0x2af   : > { %830 = vmatprep.subr.bf16.mxu1 %v829_v51  ;;  %v608_v49 = vmul.f32 %v603_v19, %v1043_v14  ;;  %v609_v56 = vmul.f32 %v607_v52, %v1046_v15 }
 0x2b0   : > { %832 = vmatpush1.bf16.msra.mxu1 %v831_v18 }
 0x2b1   : > { %v611_v53 = vpop.permute.xlu0 %610  ;;  %v613_v54 = vpop.permute.xlu1 %612 }
 0x2b2   : > { %v614_v55 = vsel %vm355_vm6, %v611_v53, %v613_v54  ;;  %v618_v48 = vsel %vm355_vm6, %v613_v54, %v611_v53 }
 0x2b3   : > { %v619_v57 = vmul.f32 %v614_v55, %v1028_v61  ;;  %v620_v58 = vmul.f32 %v618_v48, %v1031_v62  ;;  %v541_v61 = vld [vmem:[%s1148_s3] sm:$0xff] }
 0x2b5   : > { %v622_v59 = vpop.permute.xlu0 %621  ;;  %v624_v60 = vpop.permute.xlu1 %623  ;;  %v833_v63 = vpack.c.bf16 %v620_v58, %v609_v56  ;;  %v835_v2 = vpack.c.bf16 %v619_v57, %v608_v49 }
 0x2b6   : > { %v629_v3 = vsel %vm380_vm8, %v624_v60, %v622_v59  ;;  %v625_v4 = vsel %vm380_vm8, %v622_v59, %v624_v60 }
 0x2b7   : > { %v631_v5 = vmul.f32 %v629_v3, %v1054_v27  ;;  %834 = vmatprep.subr.bf16.mxu1 %v833_v63  ;;  %v630_v14 = vmul.f32 %v625_v4, %v1059_v32 }
 0x2b8   : > { %836 = vmatpush1.bf16.msra.mxu1 %v835_v2 }
 0x2b9   : > { %652 = vmatprep.subr.mxu1 %v631_v5 }
 0x2bc   : > { %653 = vmatpush1.msra.mxu1 %v630_v14 }
 0x2bd   : > { %808 = vmatmul.mubr.msk.f32.vlgmr.msra.gmra.mrb[0].mxu1 %vm632_vm12, %v541_v61 }
 0x390   : > { %v702_v62 = vpop.f32.mrb[0].mxu1 }
 0x391   : > { %v704_v15 = vpop.f32.mrb[1].mxu1  ;;  %v710_v6 = vmul.f32 %v702_v62, %v702_v62 }
 0x392   : > { %v711_v9 = vmul.f32 %v704_v15, %v704_v15  ;;  %v707_v10 = vadd.f32 %v704_v15, %v702_v62 }
 0x394   : > { %708 = vadd.xlane.f32.xlu0 %v707_v10  ;;  %v712_v27 = vadd.f32 %v711_v9, %v710_v6 }
 0x396   : > { %713 = vadd.xlane.f32.xlu1 %v712_v27 }
 0x421   : > { %v709_v11 = vpop.xlane.xlu0 %708 }
 0x422   : > { %v715_v16 = vmul.f32 0.00390625, %v709_v11 }
 0x423   : > { %v714_v17 = vpop.xlane.xlu1 %713 }
 0x424   : > { %v716_v32 = vmul.f32 0.00390625, %v714_v17  ;;  %v717_v20 = vmul.f32 %v715_v16, %v715_v16  ;;  %v720_v26 = vsub.f32 %v702_v62, %v715_v16  ;;  %v721_v28 = vsub.f32 %v704_v15, %v715_v16 }
 0x426   : > { %v718_v21 = vsub.f32 %v716_v32, %v717_v20 }
 0x428   : > { %v719_v22 = vmax.f32 %v718_v21, 0.0 }
 0x42a   : > { %v722_v23 = vadd.f32 1e-05, %v719_v22 }
 0x42c   : > { %857 = vrsqrt.f32 %v722_v23 }
 0x436   : > { %v858_v29 = vpop.eup %857 }
 0x437   : > { %v724_v30 = vmul.f32 %v858_v29, %v720_v26  ;;  %v725_v31 = vmul.f32 %v858_v29, %v721_v28 }
 0x439   : > { %vm726_vm13 = vcmp.gt.f32.partialorder %v724_v30, 0.0  ;;  %vm727_vm14 = vcmp.gt.f32.partialorder %v725_v31, 0.0  ;;  %v728_v35 = vmul.f32 0.2, %v724_v30  ;;  %v729_v36 = vmul.f32 0.2, %v725_v31 }
 0x43b   : > { %v730_v37 = vsel %vm726_vm13, %v724_v30, %v728_v35  ;;  %v731_v38 = vsel %vm727_vm14, %v725_v31, %v729_v36 }
 0x43c   : > { %732 = vst [vmem:[%s197_s26] sm:$0xff] %v730_v37  ;;  %733 = vst [vmem:[%s197_s26 + $0x8] sm:$0xff] %v731_v38 }
 0x43d PF: > { %s14_s15 = sadd.s32 1, %s865_s15  }
 0x43e   : > { %p11_p4 = scmp.ge.s32.totalorder %s14_s15, 4  }
 0x440   :  { %13 = sbr.rel (!%p11_p4) target bundleno = 1 (0x1), region = 73 }

</bundles_post_ra>
